<compile_context>
chip_gen: v5e
topology: v5e:2x2
jax: 0.10.0
libtpu: 0.0.40
codegen_flags: <defaults>
</compile_context>

<pallas_src>
import functools
import math

import jax
import jax.numpy as jnp
import numpy as np
from jax import lax
from jax.experimental import pallas as pl
from jax.experimental.pallas import tpu as pltpu


def _sface_kernel(xn_ref, w_ref, lab_ref, *out_refs,
                  s, k, b, with_output, fast_weight_j):
    if with_output:
        out_ref, wyi_ref, inter_ref, wjs_ref = out_refs
    else:
        wyi_ref, inter_ref, wjs_ref = out_refs

    j = pl.program_id(1)                 # class-tile index (innermost reduction)

    @pl.when(j == 0)
    def _init():
        wyi_ref[...] = jnp.zeros_like(wyi_ref)
        inter_ref[...] = jnp.zeros_like(inter_ref)
        wjs_ref[...] = jnp.zeros_like(wjs_ref)

    x_n = xn_ref[...]                    # (tb, D) -- pre-normalized in wrapper
    w = w_ref[...]                       # (tc, D) -- current class tile

    # Row-normalize the weight tile with rsqrt (EUP slot, no divide/sqrt).
    w_sq = jnp.sum(w * w, axis=-1, keepdims=True)
    w_n = w * lax.rsqrt(jnp.maximum(w_sq, 1e-24))

    # cosine = normalize(x) @ normalize(W).T ("NT" matmul: contraction on the
    # lane-minor dim of both operands -- no wrapper-side transpose of W).
    cosine = lax.dot_general(x_n, w_n, (((1,), (1,)), ((), ())),
                             preferred_element_type=jnp.float32)   # (tb, tc)

    if with_output:
        out_ref[...] = cosine * s        # lane-dense f32 output store

    tb, tc = cosine.shape
    col = lax.broadcasted_iota(jnp.int32, (tb, tc), 1) + j * tc
    # One select instead of float one_hot/zero_hot masks + extra muls.
    oh_cos = jnp.where(col == lab_ref[...], cosine, 0.0)   # one_hot * cosine
    wj_c = cosine - oh_cos                                  # zero_hot*cosine == Wj/s

    # weight_j = sigmoid(-k * (arccos(Wj/s) - b))
    if fast_weight_j:
        # k is large => sigmoid is a sharp step at c = cos(b).  Fold a 2nd-order
        # expansion of arccos around cos(b) into the sigmoid logit: exact in
        # both saturation regimes, ~3e-4 max error in the transition band.
        cb = math.cos(b)
        sb = math.sin(b)
        c1 = 0.5 * k / sb
        c2 = 0.25 * k * cb / (sb ** 3)
        dc = wj_c - cb
        half_logit = dc * (c1 + c2 * dc)          # == -0.5*k*(theta_approx - b)
        weight_j = 0.5 * (1.0 + jnp.tanh(half_logit))
    else:
        theta_j = jnp.arccos(jnp.clip(wj_c, -1.0, 1.0))
        weight_j = 0.5 * (1.0 + jnp.tanh(-0.5 * k * (theta_j - b)))
    # TODO(synk): on v6e/v7x this epilogue could run in bf16 (2x VALU width);
    # kept f32 so the 1e-4 checks on output and Wj_s.mean() stay safe everywhere.

    # Row partial sums in cosine units (scaled by s once, in the glue).
    s_oh = jnp.sum(oh_cos, axis=1, keepdims=True)
    s_cos = jnp.sum(cosine, axis=1, keepdims=True)
    wyi_ref[...] += s_oh
    inter_ref[...] += jnp.sum(weight_j * wj_c, axis=1, keepdims=True)
    wjs_ref[...] += s_cos - s_oh         # zero_hot row sum without an extra mask mul


def _tpu_hints():
    """Return (per-core VMEM bytes, prefer >=2 batch tiles) with safe fallbacks."""
    vmem = 64 * 1024 * 1024              # conservative default: v7x per-TC size
    try:
        info = pltpu.get_tpu_info()
        vmem = int(getattr(info, "vmem_capacity_bytes", vmem))
    except Exception:
        pass
    prefer_two = False
    try:
        kind = jax.devices()[0].device_kind.lower()
        # Chips with 2 TensorCores: keep the "parallel" batch axis length >= 2.
        prefer_two = any(t in kind for t in ("v7", "7x", "v4", "v3"))
    except Exception:
        pass
    return vmem, prefer_two


def _pick_tiles(B, C, D, vmem_budget, prefer_two_batch_tiles, with_output):
    """Largest batch tile first (W is re-streamed from HBM once per batch tile),
    then the largest class tile that fits the VMEM budget."""
    bt = [t for t in (1024, 512, 256, 128, 64, 32, 16, 8) if B % t == 0] or [B]
    if prefer_two_batch_tiles:
        bt2 = [t for t in bt if B // t >= 2]
        if bt2:
            bt = bt2
    ct = [t for t in (4096, 2048, 1024, 512, 256, 128) if C % t == 0]
    for tb in bt:
        for tc in ct:
            need = 4 * (2 * tc * D                              # W tile (x2 buffers)
                        + (2 * tb * tc if with_output else 0)   # output tile
                        + 2 * tb * D                            # x tile
                        + 8 * tb * 128)                         # accs/labels (padded)
            if need + (2 << 20) <= vmem_budget:
                return tb, tc
    return None, None


def sface_loss(x, weight, label, *, s=64.0, k=80.0, a=0.8, b=1.22,
               return_output=True):
    B, D = x.shape
    C, D2 = weight.shape
    assert D == D2, "weight must be (out_features, in_features)"

    vmem_cap, prefer_two = _tpu_hints()
    vmem_limit = min(int(vmem_cap * 3 // 4), 100 * 1024 * 1024)
    vmem_limit = max(vmem_limit, 32 * 1024 * 1024)
    tb, tc = _pick_tiles(B, C, D, vmem_limit - (4 << 20), prefer_two, return_output)
    if tc is None:
        # TODO(synk): masked tail path for out_features not divisible by 128.
        raise ValueError(
            "sface_loss: need out_features divisible by 128 and a "
            "(class_tile x in_features) weight tile that fits the VMEM budget "
            f"({vmem_limit} bytes); got in_features={D}, out_features={C}.")

    lab = label.reshape(B, 1).astype(jnp.int32)
    # Hoist the (tiny, B x D) x normalization out of the class-tiled loop.
    x_n = x * lax.rsqrt(jnp.maximum(jnp.sum(x * x, axis=-1, keepdims=True), 1e-24))

    # Fused arccos+sigmoid approximation only when the sigmoid is sharp enough
    # and b is away from the arccos endpoints; otherwise use the exact chain.
    fast_weight_j = (k >= 32.0) and (0.05 < b < math.pi - 0.05)

    kernel = functools.partial(_sface_kernel, s=s, k=k, b=b,
                               with_output=return_output,
                               fast_weight_j=fast_weight_j)

    acc_shape = jax.ShapeDtypeStruct((B, 1), jnp.float32)
    acc_spec = pl.BlockSpec((tb, 1), lambda i, j: (i, 0))
    out_shapes = (acc_shape, acc_shape, acc_shape)      # wyi, inter, wjs (cosine units)
    out_specs = (acc_spec, acc_spec, acc_spec)
    if return_output:
        out_shapes = (jax.ShapeDtypeStruct((B, C), jnp.float32),) + out_shapes
        out_specs = (pl.BlockSpec((tb, tc), lambda i, j: (i, j)),) + out_specs

    grid_spec = pltpu.PrefetchScalarGridSpec(
        num_scalar_prefetch=0,
        grid=(B // tb, C // tc),
        in_specs=[
            pl.BlockSpec((tb, D), lambda i, j: (i, 0)),   # pre-normalized x tile
            pl.BlockSpec((tc, D), lambda i, j: (j, 0)),   # weight class tile
            pl.BlockSpec((tb, 1), lambda i, j: (i, 0)),   # labels
        ],
        out_specs=out_specs,
    )
    results = pl.pallas_call(
        kernel,
        out_shape=out_shapes,
        grid_spec=grid_spec,
        compiler_params=pltpu.CompilerParams(
            dimension_semantics=("parallel", "arbitrary"),
            vmem_limit_bytes=vmem_limit,
        ),
    )(x_n, weight, lab)

    if return_output:
        output, wyi_cos, inter_acc, wjs_acc = results
    else:
        output = None
        wyi_cos, inter_acc, wjs_acc = results

    # Batch-scalar glue (B values each): intra finalize + means.
    WyiX = wyi_cos * s
    theta_yi = jnp.arccos(jnp.clip(wyi_cos, -1.0, 1.0))
    weight_yi = jax.nn.sigmoid(k * (theta_yi - a))        # 1/(1+exp(-k*(theta-a)))
    intra_mean = jnp.mean(-weight_yi * WyiX)
    inter_mean = jnp.mean(inter_acc) * s
    loss = intra_mean + inter_mean
    wyi_s_mean = jnp.mean(wyi_cos)                        # mean of WyiX / s
    wj_s_mean = jnp.mean(wjs_acc) / C                     # mean over all B*C of Wj/s
    return output, loss, intra_mean, inter_mean, wyi_s_mean, wj_s_mean


def sface_loss_ref(x, weight, label, *, s=64.0, k=80.0, a=0.8, b=1.22):
    """Pure-JAX reference mirroring the PyTorch forward (device_id=None path)."""
    xn = x / jnp.maximum(jnp.linalg.norm(x, axis=1, keepdims=True), 1e-12)
    wn = weight / jnp.maximum(jnp.linalg.norm(weight, axis=1, keepdims=True), 1e-12)
    cosine = jnp.matmul(xn, wn.T, precision=lax.Precision.HIGHEST)
    output = cosine * s
    B, C = cosine.shape
    one_hot = jax.nn.one_hot(label, C, dtype=jnp.float32)
    zero_hot = 1.0 - one_hot
    WyiX = jnp.sum(one_hot * output, axis=1)
    theta_yi = jnp.arccos(WyiX / s)
    weight_yi = 1.0 / (1.0 + jnp.exp(-k * (theta_yi - a)))
    intra = -weight_yi * WyiX
    Wj = zero_hot * output
    theta_j = jnp.arccos(Wj / s)
    weight_j = 1.0 / (1.0 + jnp.exp(k * (theta_j - b)))
    inter = jnp.sum(weight_j * Wj, axis=1)
    loss = intra.mean() + inter.mean()
    return output, loss, intra.mean(), inter.mean(), (WyiX / s).mean(), (Wj / s).mean()


if __name__ == "__main__":
    B, IN_FEATURES, OUT_FEATURES = 8, 128, 256
    S, K, A, Bp = 64.0, 80.0, 0.8, 1.22

    key = jax.random.PRNGKey(0)
    kx, kw, kl = jax.random.split(key, 3)

    x = jax.random.normal(kx, (B, IN_FEATURES), dtype=jnp.float32)
    # nn.init.xavier_uniform_(weight, gain=2): U(-bound, bound),
    # bound = gain * sqrt(6 / (fan_in + fan_out))
    bound = 2.0 * math.sqrt(6.0 / (IN_FEATURES + OUT_FEATURES))
    weight = jax.random.uniform(kw, (OUT_FEATURES, IN_FEATURES),
                                minval=-bound, maxval=bound, dtype=jnp.float32)
    label = jax.random.randint(kl, (B,), 0, OUT_FEATURES, dtype=jnp.int32)

    res = sface_loss(x, weight, label, s=S, k=K, a=A, b=Bp)
    res = jax.block_until_ready(res)
    output, loss, intra_m, inter_m, wyi_s_m, wj_s_m = res

    ref = sface_loss_ref(x, weight, label, s=S, k=K, a=A, b=Bp)
    ref_out, ref_loss, ref_intra, ref_inter, ref_wyi, ref_wj = ref

    np.testing.assert_allclose(np.asarray(output), np.asarray(ref_out),
                               rtol=1e-4, atol=1e-3)
    np.testing.assert_allclose(np.asarray(loss), np.asarray(ref_loss),
                               rtol=1e-2, atol=1e-2)
    np.testing.assert_allclose(np.asarray(intra_m), np.asarray(ref_intra),
                               rtol=1e-2, atol=1e-2)
    np.testing.assert_allclose(np.asarray(inter_m), np.asarray(ref_inter),
                               rtol=1e-2, atol=1e-2)
    np.testing.assert_allclose(np.asarray(wyi_s_m), np.asarray(ref_wyi),
                               rtol=1e-4, atol=1e-4)
    np.testing.assert_allclose(np.asarray(wj_s_m), np.asarray(ref_wj),
                               rtol=1e-4, atol=1e-4)

    # Loss-only path: skips the (B, C) output stream entirely.
    res_no_out = sface_loss(x, weight, label, s=S, k=K, a=A, b=Bp,
                            return_output=False)
    jax.block_until_ready(res_no_out[1])
    assert res_no_out[0] is None
    np.testing.assert_allclose(np.asarray(res_no_out[1]), np.asarray(ref_loss),
                               rtol=1e-2, atol=1e-2)

    print("KERNEL_OK")
</pallas_src>

<mosaic_0001>
module attributes {stable_mosaic.version = 11 : i64} {
  func.func @_sface_kernel(%arg0: i32, %arg1: i32, %arg2: memref<8x128xf32, #tpu.memory_space<vmem>>, %arg3: memref<256x128xf32, #tpu.memory_space<vmem>>, %arg4: memref<8x1xi32, #tpu.memory_space<vmem>>, %arg5: memref<8x256xf32, #tpu.memory_space<vmem>>, %arg6: memref<8x1xf32, #tpu.memory_space<vmem>>, %arg7: memref<8x1xf32, #tpu.memory_space<vmem>>, %arg8: memref<8x1xf32, #tpu.memory_space<vmem>>) attributes {dimension_semantics = [#tpu.dimension_semantics<parallel>, #tpu.dimension_semantics<arbitrary>], iteration_bounds = array<i64: 1, 1>, scalar_prefetch = 0 : i64, scratch_operands = 0 : i64, tpu.core_type = #tpu.core_type<tc>, window_params = [{transform_indices = @transform_0, window_bounds = array<i64: 8, 128>}, {transform_indices = @transform_1, window_bounds = array<i64: 256, 128>}, {transform_indices = @transform_2, window_bounds = array<i64: 8, 1>}, {transform_indices = @transform_3, window_bounds = array<i64: 8, 256>}, {transform_indices = @transform_4, window_bounds = array<i64: 8, 1>}, {transform_indices = @transform_5, window_bounds = array<i64: 8, 1>}, {transform_indices = @transform_6, window_bounds = array<i64: 8, 1>}]} {
    %c0_i32 = arith.constant 0 : i32
    %0 = arith.cmpi eq, %arg1, %c0_i32 : i32
    %1 = arith.extui %0 : i1 to i32
    %c0_i32_0 = arith.constant 0 : i32
    %2 = arith.cmpi ne, %1, %c0_i32_0 : i32
    scf.if %2 {
      %cst_32 = arith.constant 0.000000e+00 : f32
      %56 = vector.broadcast %cst_32 : f32 to vector<8x1xf32>
      %c0_33 = arith.constant 0 : index
      %c0_34 = arith.constant 0 : index
      %57 = vector.load %arg6[%c0_33, %c0_34] : memref<8x1xf32, #tpu.memory_space<vmem>>, vector<8x1xf32>
      tpu.vector_store %arg6[%c0_33, %c0_34], %56 {strides = array<i32>} : memref<8x1xf32, #tpu.memory_space<vmem>>, vector<8x1xf32>,
      %cst_35 = arith.constant 0.000000e+00 : f32
      %58 = vector.broadcast %cst_35 : f32 to vector<8x1xf32>
      %c0_36 = arith.constant 0 : index
      %c0_37 = arith.constant 0 : index
      %59 = vector.load %arg7[%c0_36, %c0_37] : memref<8x1xf32, #tpu.memory_space<vmem>>, vector<8x1xf32>
      tpu.vector_store %arg7[%c0_36, %c0_37], %58 {strides = array<i32>} : memref<8x1xf32, #tpu.memory_space<vmem>>, vector<8x1xf32>,
      %cst_38 = arith.constant 0.000000e+00 : f32
      %60 = vector.broadcast %cst_38 : f32 to vector<8x1xf32>
      %c0_39 = arith.constant 0 : index
      %c0_40 = arith.constant 0 : index
      %61 = vector.load %arg8[%c0_39, %c0_40] : memref<8x1xf32, #tpu.memory_space<vmem>>, vector<8x1xf32>
      tpu.vector_store %arg8[%c0_39, %c0_40], %60 {strides = array<i32>} : memref<8x1xf32, #tpu.memory_space<vmem>>, vector<8x1xf32>,
    } else {
    }
    %c0 = arith.constant 0 : index
    %c0_1 = arith.constant 0 : index
    %3 = vector.load %arg2[%c0, %c0_1] : memref<8x128xf32, #tpu.memory_space<vmem>>, vector<8x128xf32>
    %c0_2 = arith.constant 0 : index
    %c0_3 = arith.constant 0 : index
    %4 = vector.load %arg3[%c0_2, %c0_3] : memref<256x128xf32, #tpu.memory_space<vmem>>, vector<256x128xf32>
    %5 = arith.mulf %4, %4 : vector<256x128xf32>
    %cst = arith.constant dense<0.000000e+00> : vector<256xf32>
    %6 = vector.multi_reduction <add>, %5, %cst [1] : vector<256x128xf32> to vector<256xf32>
    %7 = vector.shape_cast %6 : vector<256xf32> to vector<256x1xf32>
    %cst_4 = arith.constant 1.000000e-24 : f32
    %8 = vector.broadcast %cst_4 : f32 to vector<256x1xf32>
    %9 = arith.maximumf %7, %8 : vector<256x1xf32>
    %10 = math.rsqrt %9 : vector<256x1xf32>
    %11 = vector.broadcast %10 : vector<256x1xf32> to vector<256x128xf32>
    %12 = arith.mulf %4, %11 : vector<256x128xf32>
    %cst_5 = arith.constant dense<0.000000e+00> : vector<8x256xf32>
    %13 = tpu.matmul %3, %12, %cst_5 {dimension_numbers = #tpu.dot_dimension_numbers<[1], [1], [0], [0], [0, 0, 1, 0], [], []>} : vector<8x128xf32>, vector<256x128xf32>, vector<8x256xf32> -> vector<8x256xf32>
    %cst_6 = arith.constant 6.400000e+01 : f32
    %14 = vector.broadcast %cst_6 : f32 to vector<8x256xf32>
    %15 = arith.mulf %13, %14 : vector<8x256xf32>
    %c0_7 = arith.constant 0 : index
    %c0_8 = arith.constant 0 : index
    %16 = vector.load %arg5[%c0_7, %c0_8] : memref<8x256xf32, #tpu.memory_space<vmem>>, vector<8x256xf32>
    tpu.vector_store %arg5[%c0_7, %c0_8], %15 {strides = array<i32>} : memref<8x256xf32, #tpu.memory_space<vmem>>, vector<8x256xf32>,
    %17 = tpu.iota {dimensions = array<i32: 1>} : vector<8x256xi32>
    %c256_i32 = arith.constant 256 : i32
    %18 = arith.muli %arg1, %c256_i32 : i32
    %19 = vector.broadcast %18 : i32 to vector<8x256xi32>
    %20 = arith.addi %17, %19 : vector<8x256xi32>
    %c0_9 = arith.constant 0 : index
    %c0_10 = arith.constant 0 : index
    %21 = vector.load %arg4[%c0_9, %c0_10] : memref<8x1xi32, #tpu.memory_space<vmem>>, vector<8x1xi32>
    %22 = vector.broadcast %21 : vector<8x1xi32> to vector<8x256xi32>
    %23 = arith.cmpi eq, %20, %22 : vector<8x256xi32>
    %cst_11 = arith.constant 0.000000e+00 : f32
    %24 = vector.broadcast %cst_11 : f32 to vector<8x256xf32>
    %25 = arith.select %23, %13, %24 : vector<8x256xi1>, vector<8x256xf32>
    %26 = arith.subf %13, %25 : vector<8x256xf32>
    %cst_12 = arith.constant 0.343645751 : f32
    %27 = vector.broadcast %cst_12 : f32 to vector<8x256xf32>
    %28 = arith.subf %26, %27 : vector<8x256xf32>
    %cst_13 = arith.constant 8.2986288 : f32
    %29 = vector.broadcast %cst_13 : f32 to vector<8x256xf32>
    %30 = arith.mulf %29, %28 : vector<8x256xf32>
    %cst_14 = arith.constant 4.259400e+01 : f32
    %31 = vector.broadcast %cst_14 : f32 to vector<8x256xf32>
    %32 = arith.addf %31, %30 : vector<8x256xf32>
    %33 = arith.mulf %28, %32 : vector<8x256xf32>
    %34 = math.tanh %33 : vector<8x256xf32>
    %cst_15 = arith.constant 1.000000e+00 : f32
    %35 = vector.broadcast %cst_15 : f32 to vector<8x256xf32>
    %36 = arith.addf %35, %34 : vector<8x256xf32>
    %cst_16 = arith.constant 5.000000e-01 : f32
    %37 = vector.broadcast %cst_16 : f32 to vector<8x256xf32>
    %38 = arith.mulf %37, %36 : vector<8x256xf32>
    %cst_17 = arith.constant dense<0.000000e+00> : vector<8xf32>
    %39 = vector.multi_reduction <add>, %25, %cst_17 [1] : vector<8x256xf32> to vector<8xf32>
    %40 = vector.shape_cast %39 : vector<8xf32> to vector<8x1xf32>
    %cst_18 = arith.constant dense<0.000000e+00> : vector<8xf32>
    %41 = vector.multi_reduction <add>, %13, %cst_18 [1] : vector<8x256xf32> to vector<8xf32>
    %42 = vector.shape_cast %41 : vector<8xf32> to vector<8x1xf32>
    %c0_19 = arith.constant 0 : index
    %c0_20 = arith.constant 0 : index
    %43 = vector.load %arg6[%c0_19, %c0_20] : memref<8x1xf32, #tpu.memory_space<vmem>>, vector<8x1xf32>
    %44 = arith.addf %43, %40 : vector<8x1xf32>
    %c0_21 = arith.constant 0 : index
    %c0_22 = arith.constant 0 : index
    %45 = vector.load %arg6[%c0_21, %c0_22] : memref<8x1xf32, #tpu.memory_space<vmem>>, vector<8x1xf32>
    tpu.vector_store %arg6[%c0_21, %c0_22], %44 {strides = array<i32>} : memref<8x1xf32, #tpu.memory_space<vmem>>, vector<8x1xf32>,
    %c0_23 = arith.constant 0 : index
    %c0_24 = arith.constant 0 : index
    %46 = vector.load %arg7[%c0_23, %c0_24] : memref<8x1xf32, #tpu.memory_space<vmem>>, vector<8x1xf32>
    %47 = arith.mulf %38, %26 : vector<8x256xf32>
    %cst_25 = arith.constant dense<0.000000e+00> : vector<8xf32>
    %48 = vector.multi_reduction <add>, %47, %cst_25 [1] : vector<8x256xf32> to vector<8xf32>
    %49 = vector.shape_cast %48 : vector<8xf32> to vector<8x1xf32>
    %50 = arith.addf %46, %49 : vector<8x1xf32>
    %c0_26 = arith.constant 0 : index
    %c0_27 = arith.constant 0 : index
    %51 = vector.load %arg7[%c0_26, %c0_27] : memref<8x1xf32, #tpu.memory_space<vmem>>, vector<8x1xf32>
    tpu.vector_store %arg7[%c0_26, %c0_27], %50 {strides = array<i32>} : memref<8x1xf32, #tpu.memory_space<vmem>>, vector<8x1xf32>,
    %c0_28 = arith.constant 0 : index
    %c0_29 = arith.constant 0 : index
    %52 = vector.load %arg8[%c0_28, %c0_29] : memref<8x1xf32, #tpu.memory_space<vmem>>, vector<8x1xf32>
    %53 = arith.subf %42, %40 : vector<8x1xf32>
    %54 = arith.addf %52, %53 : vector<8x1xf32>
    %c0_30 = arith.constant 0 : index
    %c0_31 = arith.constant 0 : index
    %55 = vector.load %arg8[%c0_30, %c0_31] : memref<8x1xf32, #tpu.memory_space<vmem>>, vector<8x1xf32>
    tpu.vector_store %arg8[%c0_30, %c0_31], %54 {strides = array<i32>} : memref<8x1xf32, #tpu.memory_space<vmem>>, vector<8x1xf32>,
    return
  }
  func.func @transform_0(%arg0: i32, %arg1: i32) -> (i32, i32) {
    %c0_i32 = arith.constant 0 : i32
    %c0_i32_0 = arith.constant 0 : i32
    return %arg0, %c0_i32 : i32, i32
  }
  func.func @transform_1(%arg0: i32, %arg1: i32) -> (i32, i32) {
    %c0_i32 = arith.constant 0 : i32
    %c0_i32_0 = arith.constant 0 : i32
    return %arg1, %c0_i32 : i32, i32
  }
  func.func @transform_2(%arg0: i32, %arg1: i32) -> (i32, i32) {
    %c0_i32 = arith.constant 0 : i32
    %c0_i32_0 = arith.constant 0 : i32
    return %arg0, %c0_i32 : i32, i32
  }
  func.func @transform_3(%arg0: i32, %arg1: i32) -> (i32, i32) {
    %c0_i32 = arith.constant 0 : i32
    return %arg0, %arg1 : i32, i32
  }
  func.func @transform_4(%arg0: i32, %arg1: i32) -> (i32, i32) {
    %c0_i32 = arith.constant 0 : i32
    %c0_i32_0 = arith.constant 0 : i32
    return %arg0, %c0_i32 : i32, i32
  }
  func.func @transform_5(%arg0: i32, %arg1: i32) -> (i32, i32) {
    %c0_i32 = arith.constant 0 : i32
    %c0_i32_0 = arith.constant 0 : i32
    return %arg0, %c0_i32 : i32, i32
  }
  func.func @transform_6(%arg0: i32, %arg1: i32) -> (i32, i32) {
    %c0_i32 = arith.constant 0 : i32
    %c0_i32_0 = arith.constant 0 : i32
    return %arg0, %c0_i32 : i32, i32
  }
}

</mosaic_0001>

<bundles_post_ra>
// kernel: tpu_custom_call.1
= control target key start
LH: loop header
LB: loop body
LE: loop exit
PB: predicated region body
PF: predicated region fallthrough
CT: control target
= control target key end

     0   :  { %12 = vsyncpa [#allocation3], 0  ;;  %s1521_s0 = inlined_call_operand.vmem [shape: f32[8,128], index: 0, kind: input, shape index: {}]   ;;  %s1522_s1 = inlined_call_operand.hbm [shape: f32[256,128], index: 1, kind: input, shape index: {}]   ;;  %s1523_s2 = inlined_call_operand.vmem [shape: s32[8,1], index: 2, kind: input, shape index: {}]   ;;  %s1524_s3 = inlined_call_operand.hbm [shape: f32[8,256], index: 3, kind: output, shape index: {0}]   ;;  %s1525_s4 = inlined_call_operand.vmem [shape: f32[8,1], index: 4, kind: output, shape index: {1}]   ;;  %s1526_s5 = inlined_call_operand.vmem [shape: f32[8,1], index: 5, kind: output, shape index: {2}]   ;;  %s1527_s6 = inlined_call_operand.vmem [shape: f32[8,1], index: 6, kind: output, shape index: {3}]  }
   0x1   :  { %13 = vsyncpa [#allocation4], 0  ;;  %s20_s23 = sshll.u32 %s1522_s1, 4  ;;  %s812_s24 = smov [#allocation2]   ;;  %s21_s23 = int_to_ptr.hbm [resolvable:$true] %s20_s23 }
   0x2   :  { %s22_s25 = sshll.u32 %s812_s24, 4  ;;  %s813_s26 = smov 128   ;;  %s23_s25 = int_to_ptr.vmem [resolvable:$true] %s22_s25 }
   0x3   :  { %s814_s27 = smov 8  }
   0x4   :  { %28 = dma.hbm_to_vmem [thread:$0]  %s21_s23, 4096, %s23_s25, [#allocation3], %s813_s26, %s813_s26, %s814_s27  }
   0x5   :  { %808 = dma.done.wait [#allocation3], 4096  }
   0x6   :  { %809 = vsyncadd [#allocation3], 4294963200  ;;  %v856_v0 = vld [vmem:[#allocation2 + $0x78] sm:$0xff]  ;;  %v858_v1 = vld [vmem:[#allocation2 + $0x70] sm:$0xff]  ;;  %s660_s7 = sshll.u32 %s1524_s3, 4  ;;  %s816_s8 = smov [#allocation5]   ;;  %s661_s7 = int_to_ptr.hbm [resolvable:$true] %s660_s7 }
   0x7   :  { %v860_v2 = vld [vmem:[#allocation2 + $0x68] sm:$0xff]  ;;  %v91_v3 = vmul.f32 %v856_v0, %v856_v0  ;;  %v90_v4 = vmul.f32 %v858_v1, %v858_v1  ;;  %v868_v6 = vld [vmem:[#allocation2 + $0xf8] sm:$0xff]  ;;  %v870_v7 = vld [vmem:[#allocation2 + $0xf0] sm:$0xff]  ;;  %s658_s9 = sshll.u32 %s816_s8, 4  ;;  %s659_s9 = int_to_ptr.vmem [resolvable:$true] %s658_s9 }
   0x8   :  { %v89_v5 = vmul.f32 %v860_v2, %v860_v2  ;;  %v872_v8 = vld [vmem:[#allocation2 + $0xe8] sm:$0xff]  ;;  %v107_v9 = vmul.f32 %v868_v6, %v868_v6  ;;  %v106_v10 = vmul.f32 %v870_v7, %v870_v7  ;;  %v880_v12 = vld [vmem:[#allocation2 + $0xe0] sm:$0xff]  ;;  %v884_v14 = vld [vmem:[#allocation2 + $0x58] sm:$0xff] }
   0x9   :  { %138 = vadd.xlane.f32.xlu0 %v91_v3  ;;  %136 = vadd.xlane.f32.xlu1 %v90_v4  ;;  %v105_v11 = vmul.f32 %v872_v8, %v872_v8  ;;  %v882_v13 = vld [vmem:[#allocation2 + $0x60] sm:$0xff]  ;;  %v104_v15 = vmul.f32 %v880_v12, %v880_v12  ;;  %v87_v17 = vmul.f32 %v884_v14, %v884_v14  ;;  %v892_v18 = vld [vmem:[#allocation2 + $0xd8] sm:$0xff]  ;;  %v894_v19 = vld [vmem:[#allocation2 + $0x50] sm:$0xff] }
   0xa   :  { %134 = vadd.xlane.f32.xlu2 %v89_v5  ;;  %v88_v16 = vmul.f32 %v882_v13, %v882_v13  ;;  %v896_v20 = vld [vmem:[#allocation2 + $0xd0] sm:$0xff]  ;;  %v103_v21 = vmul.f32 %v892_v18, %v892_v18  ;;  %v86_v22 = vmul.f32 %v894_v19, %v894_v19  ;;  %v904_v24 = vld [vmem:[#allocation2 + $0xc8] sm:$0xff]  ;;  %v908_v26 = vld [vmem:[#allocation2 + $0x40] sm:$0xff] }
   0xb   :  { %v102_v23 = vmul.f32 %v896_v20, %v896_v20  ;;  %v906_v25 = vld [vmem:[#allocation2 + $0x48] sm:$0xff]  ;;  %v101_v27 = vmul.f32 %v904_v24, %v904_v24  ;;  %v84_v29 = vmul.f32 %v908_v26, %v908_v26  ;;  %v916_v30 = vld [vmem:[#allocation2 + $0xc0] sm:$0xff]  ;;  %v918_v31 = vld [vmem:[#allocation2 + $0x38] sm:$0xff] }
   0xc   :  { %v85_v28 = vmul.f32 %v906_v25, %v906_v25  ;;  %v920_v32 = vld [vmem:[#allocation2 + $0xb8] sm:$0xff]  ;;  %v100_v33 = vmul.f32 %v916_v30, %v916_v30  ;;  %v83_v34 = vmul.f32 %v918_v31, %v918_v31  ;;  %v928_v36 = vld [vmem:[#allocation2 + $0xb0] sm:$0xff]  ;;  %v932_v38 = vld [vmem:[#allocation2 + $0x28] sm:$0xff] }
   0xd   :  { %v99_v35 = vmul.f32 %v920_v32, %v920_v32  ;;  %v930_v37 = vld [vmem:[#allocation2 + $0x30] sm:$0xff]  ;;  %v98_v39 = vmul.f32 %v928_v36, %v928_v36  ;;  %v81_v41 = vmul.f32 %v932_v38, %v932_v38  ;;  %v940_v42 = vld [vmem:[#allocation2 + $0xa8] sm:$0xff]  ;;  %v942_v43 = vld [vmem:[#allocation2 + $0x20] sm:$0xff] }
   0xe   :  { %v82_v40 = vmul.f32 %v930_v37, %v930_v37  ;;  %v944_v44 = vld [vmem:[#allocation2 + $0xa0] sm:$0xff]  ;;  %v97_v45 = vmul.f32 %v940_v42, %v940_v42  ;;  %v80_v46 = vmul.f32 %v942_v43, %v942_v43  ;;  %v952_v48 = vld [vmem:[#allocation2 + $0x98] sm:$0xff]  ;;  %v956_v50 = vld [vmem:[#allocation2 + $0x10] sm:$0xff] }
   0xf   :  { %v96_v47 = vmul.f32 %v944_v44, %v944_v44  ;;  %v954_v49 = vld [vmem:[#allocation2 + $0x18] sm:$0xff]  ;;  %v95_v51 = vmul.f32 %v952_v48, %v952_v48  ;;  %v78_v53 = vmul.f32 %v956_v50, %v956_v50  ;;  %v964_v54 = vld [vmem:[#allocation2 + $0x90] sm:$0xff]  ;;  %v966_v55 = vld [vmem:[#allocation2 + $0x8] sm:$0xff] }
  0x10   :  { %v79_v52 = vmul.f32 %v954_v49, %v954_v49  ;;  %v968_v56 = vld [vmem:[#allocation2 + $0x88] sm:$0xff]  ;;  %v94_v57 = vmul.f32 %v964_v54, %v964_v54  ;;  %v77_v58 = vmul.f32 %v966_v55, %v966_v55  ;;  %v976_v60 = vld [vmem:[#allocation2 + $0x80] sm:$0xff] }
  0x11   :  { %170 = vadd.xlane.f32.xlu0 %v107_v9  ;;  %168 = vadd.xlane.f32.xlu1 %v106_v10  ;;  %v93_v59 = vmul.f32 %v968_v56, %v968_v56  ;;  %v978_v61 = vld [vmem:[#allocation2] sm:$0xff]  ;;  %v92_v62 = vmul.f32 %v976_v60, %v976_v60 }
  0x12   :  { %166 = vadd.xlane.f32.xlu2 %v105_v11  ;;  %v76_v63 = vmul.f32 %v978_v61, %v978_v61 }
  0x19   :  { %164 = vadd.xlane.f32.xlu1 %v104_v15  ;;  %132 = vadd.xlane.f32.xlu0 %v88_v16 }
  0x1a   :  { %130 = vadd.xlane.f32.xlu2 %v87_v17 }
  0x21   :  { %162 = vadd.xlane.f32.xlu0 %v103_v21  ;;  %128 = vadd.xlane.f32.xlu1 %v86_v22 }
  0x22   :  { %160 = vadd.xlane.f32.xlu2 %v102_v23 }
  0x29   :  { %158 = vadd.xlane.f32.xlu1 %v101_v27  ;;  %126 = vadd.xlane.f32.xlu0 %v85_v28 }
  0x2a   :  { %124 = vadd.xlane.f32.xlu2 %v84_v29 }
  0x31   :  { %156 = vadd.xlane.f32.xlu0 %v100_v33  ;;  %122 = vadd.xlane.f32.xlu1 %v83_v34 }
  0x32   :  { %154 = vadd.xlane.f32.xlu2 %v99_v35 }
  0x39   :  { %152 = vadd.xlane.f32.xlu1 %v98_v39  ;;  %120 = vadd.xlane.f32.xlu0 %v82_v40 }
  0x3a   :  { %118 = vadd.xlane.f32.xlu2 %v81_v41 }
  0x41   :  { %150 = vadd.xlane.f32.xlu0 %v97_v45  ;;  %116 = vadd.xlane.f32.xlu1 %v80_v46 }
  0x42   :  { %148 = vadd.xlane.f32.xlu2 %v96_v47 }
  0x49   :  { %146 = vadd.xlane.f32.xlu1 %v95_v51  ;;  %114 = vadd.xlane.f32.xlu0 %v79_v52 }
  0x4a   :  { %112 = vadd.xlane.f32.xlu2 %v78_v53 }
  0x51   :  { %144 = vadd.xlane.f32.xlu0 %v94_v57  ;;  %110 = vadd.xlane.f32.xlu1 %v77_v58 }
  0x52   :  { %142 = vadd.xlane.f32.xlu2 %v93_v59 }
  0x59   :  { %140 = vadd.xlane.f32.xlu1 %v92_v62  ;;  %108 = vadd.xlane.f32.xlu0 %v76_v63 }
  0x7c   :  { %v139_v3 = vpop.xlane.xlu0 %138  ;;  %v137_v4 = vpop.xlane.xlu1 %136 }
  0x7d   :  { %v187_v5 = vmax.f32 %v139_v3, 1e-24  ;;  %v186_v9 = vmax.f32 %v137_v4, 1e-24  ;;  %v135_v10 = vpop.xlane.xlu2 %134 }
  0x7e   :  { %v984_v11 = vmax.f32 %v135_v10, 1e-24 }
  0x7f   :  { %692 = vrsqrt.f32 %v187_v5  ;;  %vm350_vm0 = vweird.f32 %v186_v9  ;;  %vm360_vm2 = vweird.f32 %v187_v5 }
  0x80   :  { %694 = vrsqrt.f32 %v186_v9  ;;  %vm340_vm4 = vweird.f32 %v984_v11 }
  0x81   :  { %696 = vrsqrt.f32 %v984_v11 }
  0x84   :  { %v171_v15 = vpop.xlane.xlu0 %170  ;;  %v169_v16 = vpop.xlane.xlu1 %168 }
  0x85   :  { %v693_v17 = vpop.eup %692  ;;  %v987_v21 = vmax.f32 %v171_v15, 1e-24  ;;  %v989_v22 = vmax.f32 %v169_v16, 1e-24  ;;  %v167_v23 = vpop.xlane.xlu2 %166 }
  0x86   :  { %v991_v27 = vpop.eup %694  ;;  %v355_v28 = vmul.f32 %v693_v17, %v187_v5  ;;  %v993_v29 = vmax.f32 %v167_v23, 1e-24  ;;  %vm361_vm1 = vweird.f32 %v693_v17 }
  0x87   :  { %v995_v33 = vpop.eup %696  ;;  %v345_v34 = vmul.f32 %v991_v27, %v186_v9  ;;  %698 = vrsqrt.f32 %v987_v21  ;;  %vm351_vm3 = vweird.f32 %v991_v27  ;;  %vm362_vm5 = vmor %vm360_vm2, %vm361_vm1  ;;  %vm510_vm6 = vweird.f32 %v989_v22 }
  0x88   :  { %v356_v35 = vmul.f32 %v693_v17, %v355_v28  ;;  %v335_v39 = vmul.f32 %v995_v33, %v984_v11  ;;  %700 = vrsqrt.f32 %v989_v22  ;;  %vm1036_vm7 = vmor %vm350_vm0, %vm351_vm3  ;;  %vm341_vm8 = vweird.f32 %v995_v33 }
  0x89   :  { %v346_v40 = vmul.f32 %v991_v27, %v345_v34  ;;  %702 = vrsqrt.f32 %v993_v29  ;;  %vm520_vm9 = vweird.f32 %v987_v21  ;;  %vm1065_vm12 = vmor %vm340_vm4, %vm341_vm8  ;;  %vm500_vm13 = vweird.f32 %v993_v29 }
  0x8a   :  { %v357_v41 = vmul.f32 0.5, %v356_v35  ;;  %v336_v45 = vmul.f32 %v995_v33, %v335_v39 }
  0x8b   :  { %v347_v46 = vmul.f32 0.5, %v346_v40 }
  0x8c   :  { %v337_v47 = vmul.f32 0.5, %v336_v45  ;;  %v165_v51 = vpop.xlane.xlu1 %164  ;;  %v133_v52 = vpop.xlane.xlu0 %132  ;;  %v358_v53 = vsub.f32 1.5, %v357_v41 }
  0x8d   :  { %v1005_v57 = vpop.eup %698  ;;  %v348_v58 = vsub.f32 1.5, %v347_v46  ;;  %v1007_v59 = vmax.f32 %v165_v51, 1e-24  ;;  %v1009_v62 = vmax.f32 %v133_v52, 1e-24  ;;  %v131_v63 = vpop.xlane.xlu2 %130 }
  0x8e   :  { %v1011_v3 = vpop.eup %700  ;;  %v515_v4 = vmul.f32 %v1005_v57, %v987_v21  ;;  %v1015_v10 = vmax.f32 %v131_v63, 1e-24  ;;  %v359_v15 = vmul.f32 %v693_v17, %v358_v53  ;;  %v338_v23 = vsub.f32 1.5, %v337_v47 }
  0x8f   :  { %v1017_v16 = vpop.eup %702  ;;  %v505_v28 = vmul.f32 %v1011_v3, %v989_v22  ;;  %704 = vrsqrt.f32 %v1007_v59  ;;  %v349_v40 = vmul.f32 %v991_v27, %v348_v58  ;;  %vm521_vm10 = vweird.f32 %v1005_v57 }
  0x90   :  { %v516_v34 = vmul.f32 %v1005_v57, %v515_v4  ;;  %v495_v35 = vmul.f32 %v1017_v16, %v993_v29  ;;  %706 = vrsqrt.f32 %v1009_v62  ;;  %v363_v39 = vsel %vm362_vm5, %v693_v17, %v359_v15  ;;  %vm522_vm14 = vmor %vm520_vm9, %vm521_vm10 }
  0x91   :  { %v506_v5 = vmul.f32 %v1011_v3, %v505_v28  ;;  %708 = vrsqrt.f32 %v1015_v10  ;;  %v539_v46 = vmul.f32 %v363_v39, %v856_v0  ;;  %v353_v52 = vsel %vm1036_vm7, %v991_v27, %v349_v40 }
  0x92   :  { %v517_v41 = vmul.f32 0.5, %v516_v34  ;;  %v496_v45 = vmul.f32 %v1017_v16, %v495_v35  ;;  %v339_v17 = vmul.f32 %v995_v33, %v338_v23  ;;  %vm511_vm11 = vweird.f32 %v1011_v3 }
  0x93   :  { %v507_v51 = vmul.f32 0.5, %v506_v5  ;;  %556 = vmatpush.xpose.msra.mxu0 %v539_v46  ;;  %v538_v5 = vmul.f32 %v353_v52, %v858_v1  ;;  %vm1098_vm15 = vmor %vm510_vm6, %vm511_vm11  ;;  %vm501_vm0 = vweird.f32 %v1017_v16  ;;  %vm330_vm1 = vweird.f32 %v1009_v62 }
  0x94   :  { %v497_v53 = vmul.f32 0.5, %v496_v45  ;;  %v163_v58 = vpop.xlane.xlu0 %162  ;;  %v129_v63 = vpop.xlane.xlu1 %128  ;;  %v518_v4 = vsub.f32 1.5, %v517_v41  ;;  %v343_v1 = vsel %vm1065_vm12, %v995_v33, %v339_v17  ;;  %vm320_vm2 = vweird.f32 %v1015_v10  ;;  %vm1111_vm3 = vmor %vm500_vm13, %vm501_vm0 }
  0x95   :  { %v1047_v0 = vpop.eup %704  ;;  %v508_v9 = vsub.f32 1.5, %v507_v51  ;;  %v1049_v15 = vmax.f32 %v163_v58, 1e-24  ;;  %v161_v28 = vpop.xlane.xlu2 %160  ;;  %v1051_v27 = vmax.f32 %v129_v63, 1e-24  ;;  %v537_v58 = vmul.f32 %v343_v1, %v860_v2 }
  0x96   :  { %v1054_v23 = vpop.eup %706  ;;  %v485_v34 = vmul.f32 %v1047_v0, %v1007_v59  ;;  %v1058_v35 = vmax.f32 %v161_v28, 1e-24  ;;  %v519_v40 = vmul.f32 %v1005_v57, %v518_v4  ;;  %v498_v45 = vsub.f32 1.5, %v497_v53 }
  0x97   :  { %v1070_v41 = vpop.eup %708  ;;  %v325_v46 = vmul.f32 %v1054_v23, %v1009_v62  ;;  %710 = vrsqrt.f32 %v1049_v15  ;;  %557 = vmatpush.xpose.msra.mxu0 %v538_v5  ;;  %v509_v52 = vmul.f32 %v1011_v3, %v508_v9  ;;  %vm331_vm4 = vweird.f32 %v1054_v23 }
  0x98   :  { %v486_v11 = vmul.f32 %v1047_v0, %v485_v34  ;;  %v315_v47 = vmul.f32 %v1070_v41, %v1015_v10  ;;  %712 = vrsqrt.f32 %v1058_v35  ;;  %v523_v33 = vsel %vm522_vm14, %v1005_v57, %v519_v40  ;;  %vm332_vm6 = vmor %vm330_vm1, %vm331_vm4 }
  0x99   :  { %v326_v51 = vmul.f32 %v1054_v23, %v325_v46  ;;  %714 = vrsqrt.f32 %v1051_v27  ;;  %v555_v63 = vmul.f32 %v523_v33, %v868_v6  ;;  %v513_v57 = vsel %vm1098_vm15, %v1011_v3, %v509_v52 }
  0x9a   :  { %v487_v17 = vmul.f32 0.5, %v486_v11  ;;  %v316_v53 = vmul.f32 %v1070_v41, %v315_v47  ;;  %v499_v9 = vmul.f32 %v1017_v16, %v498_v45  ;;  %vm321_vm5 = vweird.f32 %v1070_v41 }
  0x9b   :  { %v327_v4 = vmul.f32 0.5, %v326_v51  ;;  %558 = vmatpush.xpose.msra.mxu0 %v537_v58  ;;  %576 = vmatpush.xpose.msra.mxu1 %v555_v63  ;;  %v554_v51 = vmul.f32 %v513_v57, %v870_v7  ;;  %vm491_vm7 = vweird.f32 %v1047_v0  ;;  %vm490_vm8 = vweird.f32 %v1007_v59  ;;  %vm1159_vm10 = vmor %vm320_vm2, %vm321_vm5 }
  0x9c   :  { %v488_v2 = vsub.f32 1.5, %v487_v17  ;;  %v317_v6 = vmul.f32 0.5, %v316_v53  ;;  %v159_v22 = vpop.xlane.xlu1 %158  ;;  %v127_v28 = vpop.xlane.xlu0 %126  ;;  %v503_v46 = vsel %vm1111_vm3, %v1017_v16, %v499_v9  ;;  %vm480_vm9 = vweird.f32 %v1049_v15  ;;  %vm492_vm11 = vmor %vm490_vm8, %vm491_vm7 }
  0x9d   :  { %v1115_v3 = vpop.eup %710  ;;  %v328_v5 = vsub.f32 1.5, %v327_v4  ;;  %v1117_v39 = vmax.f32 %v159_v22, 1e-24  ;;  %v1119_v40 = vmax.f32 %v127_v28, 1e-24  ;;  %v125_v45 = vpop.xlane.xlu2 %124  ;;  %v553_v7 = vmul.f32 %v503_v46, %v872_v8 }
  0x9e   :  { %v1124_v1 = vpop.eup %712  ;;  %v318_v11 = vsub.f32 1.5, %v317_v6  ;;  %v475_v29 = vmul.f32 %v1115_v3, %v1049_v15  ;;  %v1128_v47 = vmax.f32 %v125_v45, 1e-24  ;;  %v489_v57 = vmul.f32 %v1047_v0, %v488_v2 }
  0x9f   :  { %v1131_v33 = vpop.eup %714  ;;  %v465_v52 = vmul.f32 %v1124_v1, %v1058_v35  ;;  %716 = vrsqrt.f32 %v1117_v39  ;;  %577 = vmatpush.xpose.msra.mxu1 %v554_v51  ;;  %v329_v58 = vmul.f32 %v1054_v23, %v328_v5  ;;  %vm310_vm12 = vweird.f32 %v1051_v27 }
  0xa0   :  { %v476_v16 = vmul.f32 %v1115_v3, %v475_v29  ;;  %v305_v17 = vmul.f32 %v1131_v33, %v1051_v27  ;;  %718 = vrsqrt.f32 %v1119_v40  ;;  %v319_v63 = vmul.f32 %v1070_v41, %v318_v11 }
  0xa1   :  { %v466_v53 = vmul.f32 %v1124_v1, %v465_v52  ;;  %720 = vrsqrt.f32 %v1128_v47  ;;  %v333_v9 = vsel %vm332_vm6, %v1054_v23, %v329_v58  ;;  %v493_v11 = vsel %vm492_vm11, %v1047_v0, %v489_v57 }
  0xa2   :  { %v477_v21 = vmul.f32 0.5, %v476_v16  ;;  %v306_v4 = vmul.f32 %v1131_v33, %v305_v17  ;;  %v536_v2 = vmul.f32 %v333_v9, %v882_v13  ;;  %v323_v34 = vsel %vm1159_vm10, %v1070_v41, %v319_v63 }
  0xa3   :  { %v467_v8 = vmul.f32 0.5, %v466_v53  ;;  %578 = vmatpush.xpose.msra.mxu1 %v553_v7  ;;  %v552_v41 = vmul.f32 %v493_v11, %v880_v12  ;;  %vm311_vm13 = vweird.f32 %v1131_v33  ;;  %v535_v12 = vmul.f32 %v323_v34, %v884_v14 }
  0xa4   :  { %v478_v62 = vsub.f32 1.5, %v477_v21  ;;  %v307_v22 = vmul.f32 0.5, %v306_v4  ;;  %v157_v28 = vpop.xlane.xlu0 %156  ;;  %v123_v59 = vpop.xlane.xlu1 %122  ;;  %559 = vmatpush.xpose.msra.mxu0 %v536_v2  ;;  %vm312_vm14 = vmor %vm310_vm12, %vm311_vm13  ;;  %vm481_vm15 = vweird.f32 %v1115_v3  ;;  %vm470_vm0 = vweird.f32 %v1058_v35 }
  0xa5   :  { %v1167_v23 = vpop.eup %716  ;;  %v468_v5 = vsub.f32 1.5, %v467_v8  ;;  %v1169_v10 = vmax.f32 %v157_v28, 1e-24  ;;  %v155_v45 = vpop.xlane.xlu2 %154  ;;  %v1171_v46 = vmax.f32 %v123_v59, 1e-24  ;;  %vm482_vm1 = vmor %vm480_vm9, %vm481_vm15  ;;  %vm471_vm2 = vweird.f32 %v1124_v1 }
  0xa6   :  { %v1174_v29 = vpop.eup %718  ;;  %v308_v13 = vsub.f32 1.5, %v307_v22  ;;  %v455_v51 = vmul.f32 %v1167_v23, %v1117_v39  ;;  %v1178_v52 = vmax.f32 %v155_v45, 1e-24  ;;  %v479_v63 = vmul.f32 %v1115_v3, %v478_v62  ;;  %vm1219_vm4 = vmor %vm470_vm0, %vm471_vm2 }
  0xa7   :  { %v1181_v16 = vpop.eup %720  ;;  %v295_v17 = vmul.f32 %v1174_v29, %v1119_v40  ;;  %722 = vrsqrt.f32 %v1169_v10  ;;  %579 = vmatpush.xpose.msra.mxu1 %v552_v41  ;;  %v469_v14 = vmul.f32 %v1124_v1, %v468_v5  ;;  %vm460_vm3 = vweird.f32 %v1117_v39 }
  0xa8   :  { %v456_v0 = vmul.f32 %v1167_v23, %v455_v51  ;;  %v285_v7 = vmul.f32 %v1181_v16, %v1128_v47  ;;  %724 = vrsqrt.f32 %v1178_v52  ;;  %v309_v58 = vmul.f32 %v1131_v33, %v308_v13  ;;  %560 = vmatpush.xpose.msra.mxu0 %v535_v12 }
  0xa9   :  { %v296_v53 = vmul.f32 %v1174_v29, %v295_v17  ;;  %726 = vrsqrt.f32 %v1171_v46  ;;  %v483_v6 = vsel %vm482_vm1, %v1115_v3, %v479_v63  ;;  %vm301_vm5 = vweird.f32 %v1174_v29 }
  0xaa   :  { %v457_v21 = vmul.f32 0.5, %v456_v0  ;;  %v286_v4 = vmul.f32 %v1181_v16, %v285_v7  ;;  %v313_v8 = vsel %vm312_vm14, %v1131_v33, %v309_v58  ;;  %v551_v59 = vmul.f32 %v483_v6, %v892_v18 }
  0xab   :  { %v297_v57 = vmul.f32 0.5, %v296_v53  ;;  %v534_v27 = vmul.f32 %v313_v8, %v894_v19  ;;  %v473_v18 = vsel %vm1219_vm4, %v1124_v1, %v469_v14  ;;  %vm300_vm6 = vweird.f32 %v1119_v40 }
  0xac   :  { %v287_v9 = vmul.f32 0.5, %v286_v4  ;;  %v153_v62 = vpop.xlane.xlu1 %152  ;;  %v121_v22 = vpop.xlane.xlu0 %120  ;;  %v458_v3 = vsub.f32 1.5, %v457_v21  ;;  %580 = vmatpush.xpose.msra.mxu1 %v551_v59  ;;  %v550_v0 = vmul.f32 %v473_v18, %v896_v20  ;;  %vm302_vm7 = vmor %vm300_vm6, %vm301_vm5  ;;  %vm461_vm8 = vweird.f32 %v1167_v23 }
  0xad   :  { %v1210_v2 = vpop.eup %722  ;;  %v298_v28 = vsub.f32 1.5, %v297_v57  ;;  %v1213_v33 = vmax.f32 %v153_v62, 1e-24  ;;  %v1215_v15 = vmax.f32 %v121_v22, 1e-24  ;;  %v119_v34 = vpop.xlane.xlu2 %118  ;;  %561 = vmatpush.xpose.msra.mxu0 %v534_v27  ;;  %vm290_vm9 = vweird.f32 %v1128_v47  ;;  %vm462_vm10 = vmor %vm460_vm3, %vm461_vm8 }
  0xae   :  { %v1223_v19 = vpop.eup %724  ;;  %v445_v45 = vmul.f32 %v1210_v2, %v1169_v10  ;;  %v1227_v11 = vmax.f32 %v119_v34, 1e-24  ;;  %v288_v35 = vsub.f32 1.5, %v287_v9  ;;  %v459_v40 = vmul.f32 %v1167_v23, %v458_v3 }
  0xaf   :  { %v1232_v13 = vpop.eup %726  ;;  %v435_v51 = vmul.f32 %v1223_v19, %v1178_v52  ;;  %728 = vrsqrt.f32 %v1213_v33  ;;  %v299_v7 = vmul.f32 %v1174_v29, %v298_v28  ;;  %vm291_vm11 = vweird.f32 %v1181_v16 }
  0xb0   :  { %v446_v41 = vmul.f32 %v1210_v2, %v445_v45  ;;  %v275_v17 = vmul.f32 %v1232_v13, %v1171_v46  ;;  %730 = vrsqrt.f32 %v1215_v15  ;;  %581 = vmatpush.xpose.msra.mxu1 %v550_v0  ;;  %v289_v20 = vmul.f32 %v1181_v16, %v288_v35  ;;  %vm1267_vm12 = vmor %vm290_vm9, %vm291_vm11 }
  0xb1   :  { %v436_v1 = vmul.f32 %v1223_v19, %v435_v51  ;;  %732 = vrsqrt.f32 %v1227_v11  ;;  %v303_v58 = vsel %vm302_vm7, %v1174_v29, %v299_v7  ;;  %v463_v14 = vsel %vm462_vm10, %v1167_v23, %v459_v40 }
  0xb2   :  { %v447_v12 = vmul.f32 0.5, %v446_v41  ;;  %v276_v53 = vmul.f32 %v1232_v13, %v275_v17  ;;  %v533_v4 = vmul.f32 %v303_v58, %v906_v25  ;;  %v549_v29 = vmul.f32 %v463_v14, %v904_v24 }
  0xb3   :  { %v437_v63 = vmul.f32 0.5, %v436_v1  ;;  %v293_v24 = vsel %vm1267_vm12, %v1181_v16, %v289_v20  ;;  %vm450_vm13 = vweird.f32 %v1169_v10  ;;  %vm280_vm14 = vweird.f32 %v1171_v46 }
  0xb4   :  { %v277_v21 = vmul.f32 0.5, %v276_v53  ;;  %v151_v57 = vpop.xlane.xlu0 %150  ;;  %v117_v8 = vpop.xlane.xlu1 %116  ;;  %v448_v27 = vsub.f32 1.5, %v447_v12  ;;  %562 = vmatpush.xpose.msra.mxu0 %v533_v4  ;;  %582 = vmatpush.xpose.msra.mxu1 %v549_v29  ;;  %v532_v18 = vmul.f32 %v293_v24, %v908_v26  ;;  %vm281_vm15 = vweird.f32 %v1232_v13 }
  0xb5   :  { %v1258_v9 = vpop.eup %728  ;;  %v1261_v6 = vmax.f32 %v151_v57, 1e-24  ;;  %v149_v39 = vpop.xlane.xlu2 %148  ;;  %v1263_v62 = vmax.f32 %v117_v8, 1e-24  ;;  %v438_v5 = vsub.f32 1.5, %v437_v63  ;;  %vm440_vm0 = vweird.f32 %v1178_v52  ;;  %vm282_vm2 = vmor %vm280_vm14, %vm281_vm15 }
  0xb6   :  { %v1271_v25 = vpop.eup %730  ;;  %v278_v23 = vsub.f32 1.5, %v277_v21  ;;  %v425_v28 = vmul.f32 %v1258_v9, %v1213_v33  ;;  %v1275_v59 = vmax.f32 %v149_v39, 1e-24  ;;  %v449_v17 = vmul.f32 %v1210_v2, %v448_v27 }
  0xb7   :  { %v1280_v34 = vpop.eup %732  ;;  %v265_v47 = vmul.f32 %v1271_v25, %v1215_v15  ;;  %734 = vrsqrt.f32 %v1261_v6  ;;  %vm430_vm1 = vweird.f32 %v1213_v33  ;;  %vm451_vm3 = vweird.f32 %v1210_v2 }
  0xb8   :  { %v426_v3 = vmul.f32 %v1258_v9, %v425_v28  ;;  %v255_v45 = vmul.f32 %v1280_v34, %v1227_v11  ;;  %736 = vrsqrt.f32 %v1275_v59  ;;  %v279_v35 = vmul.f32 %v1232_v13, %v278_v23  ;;  %563 = vmatpush.xpose.msra.mxu0 %v532_v18  ;;  %vm452_vm4 = vmor %vm450_vm13, %vm451_vm3 }
  0xb9   :  { %v266_v16 = vmul.f32 %v1271_v25, %v265_v47  ;;  %738 = vrsqrt.f32 %v1263_v62  ;;  %v439_v53 = vmul.f32 %v1223_v19, %v438_v5  ;;  %vm441_vm5 = vweird.f32 %v1223_v19 }
  0xba   :  { %v427_v51 = vmul.f32 0.5, %v426_v3  ;;  %v256_v41 = vmul.f32 %v1280_v34, %v255_v45  ;;  %v283_v0 = vsel %vm282_vm2, %v1232_v13, %v279_v35  ;;  %v453_v20 = vsel %vm452_vm4, %v1210_v2, %v449_v17  ;;  %vm442_vm7 = vmor %vm440_vm0, %vm441_vm5 }
  0xbb   :  { %v267_v1 = vmul.f32 0.5, %v266_v16  ;;  %v531_v46 = vmul.f32 %v283_v0, %v918_v31  ;;  %v548_v14 = vmul.f32 %v453_v20, %v916_v30  ;;  %vm271_vm6 = vweird.f32 %v1271_v25 }
  0xbc   :  { %v257_v26 = vmul.f32 0.5, %v256_v41  ;;  %v147_v7 = vpop.xlane.xlu1 %146  ;;  %v115_v12 = vpop.xlane.xlu0 %114  ;;  %v428_v58 = vsub.f32 1.5, %v427_v51  ;;  %vm270_vm8 = vweird.f32 %v1215_v15  ;;  %v443_v22 = vsel %vm442_vm7, %v1223_v19, %v439_v53 }
  0xbd   :  { %v1308_v40 = vpop.eup %734  ;;  %v1312_v63 = vmax.f32 %v147_v7, 1e-24  ;;  %v113_v21 = vpop.xlane.xlu2 %112  ;;  %v268_v10 = vsub.f32 1.5, %v267_v1  ;;  %v1319_v57 = vmax.f32 %v115_v12, 1e-24  ;;  %564 = vmatpush.xpose.msra.mxu0 %v531_v46  ;;  %583 = vmatpush.xpose.msra.mxu1 %v548_v14  ;;  %vm260_vm9 = vweird.f32 %v1227_v11  ;;  %vm272_vm11 = vmor %vm270_vm8, %vm271_vm6 }
  0xbe   :  { %v1314_v13 = vpop.eup %736  ;;  %v415_v4 = vmul.f32 %v1308_v40, %v1261_v6  ;;  %v1326_v2 = vmax.f32 %v113_v21, 1e-24  ;;  %v258_v27 = vsub.f32 1.5, %v257_v26  ;;  %v547_v28 = vmul.f32 %v443_v22, %v920_v32 }
  0xbf   :  { %v1321_v8 = vpop.eup %738  ;;  %v405_v31 = vmul.f32 %v1314_v13, %v1275_v59  ;;  %740 = vrsqrt.f32 %v1312_v63  ;;  %v269_v24 = vmul.f32 %v1271_v25, %v268_v10  ;;  %vm250_vm10 = vweird.f32 %v1263_v62 }
  0xc0   :  { %v416_v29 = vmul.f32 %v1308_v40, %v415_v4  ;;  %v245_v30 = vmul.f32 %v1321_v8, %v1263_v62  ;;  %742 = vrsqrt.f32 %v1319_v57  ;;  %v429_v52 = vmul.f32 %v1258_v9, %v428_v58 }
  0xc1   :  { %v406_v39 = vmul.f32 %v1314_v13, %v405_v31  ;;  %744 = vrsqrt.f32 %v1326_v2  ;;  %vm431_vm12 = vweird.f32 %v1258_v9  ;;  %vm420_vm13 = vweird.f32 %v1261_v6  ;;  %584 = vmatpush.xpose.msra.mxu1 %v547_v28 }
  0xc2   :  { %v246_v23 = vmul.f32 %v1321_v8, %v245_v30  ;;  %v417_v47 = vmul.f32 0.5, %v416_v29  ;;  %v273_v5 = vsel %vm272_vm11, %v1271_v25, %v269_v24  ;;  %vm432_vm14 = vmor %vm430_vm1, %vm431_vm12  ;;  %v259_v45 = vmul.f32 %v1280_v34, %v258_v27 }
  0xc3   :  { %v407_v15 = vmul.f32 0.5, %v406_v39  ;;  %v530_v18 = vmul.f32 %v273_v5, %v930_v37  ;;  %v433_v35 = vsel %vm432_vm14, %v1258_v9, %v429_v52  ;;  %vm261_vm15 = vweird.f32 %v1280_v34 }
  0xc4   :  { %v247_v19 = vmul.f32 0.5, %v246_v23  ;;  %v145_v32 = vpop.xlane.xlu0 %144  ;;  %v111_v3 = vpop.xlane.xlu1 %110  ;;  %v546_v1 = vmul.f32 %v433_v35, %v928_v36  ;;  %v418_v37 = vsub.f32 1.5, %v417_v47  ;;  %vm410_vm0 = vweird.f32 %v1275_v59  ;;  %vm262_vm1 = vmor %vm260_vm9, %vm261_vm15 }
  0xc5   :  { %v1355_v16 = vpop.eup %740  ;;  %v1359_v51 = vmax.f32 %v145_v32, 1e-24  ;;  %v143_v41 = vpop.xlane.xlu2 %142  ;;  %565 = vmatpush.xpose.msra.mxu0 %v530_v18  ;;  %v1375_v7 = vmax.f32 %v111_v3, 1e-24  ;;  %v408_v12 = vsub.f32 1.5, %v407_v15  ;;  %vm240_vm2 = vweird.f32 %v1319_v57 }
  0xc6   :  { %v1362_v17 = vpop.eup %742  ;;  %v248_v25 = vsub.f32 1.5, %v247_v19  ;;  %v395_v33 = vmul.f32 %v1355_v16, %v1312_v63  ;;  %v1367_v26 = vmax.f32 %v143_v41, 1e-24  ;;  %585 = vmatpush.xpose.msra.mxu1 %v546_v1  ;;  %v263_v46 = vsel %vm262_vm1, %v1280_v34, %v259_v45 }
  0xc7   :  { %v1369_v0 = vpop.eup %744  ;;  %v235_v9 = vmul.f32 %v1362_v17, %v1319_v57  ;;  %746 = vrsqrt.f32 %v1359_v51  ;;  %v529_v10 = vmul.f32 %v263_v46, %v932_v38  ;;  %vm400_vm3 = vweird.f32 %v1312_v63 }
  0xc8   :  { %v396_v53 = vmul.f32 %v1355_v16, %v395_v33  ;;  %v225_v36 = vmul.f32 %v1369_v0, %v1326_v2  ;;  %748 = vrsqrt.f32 %v1367_v26  ;;  %v249_v4 = vmul.f32 %v1321_v8, %v248_v25 }
  0xc9   :  { %v236_v58 = vmul.f32 %v1362_v17, %v235_v9  ;;  %750 = vrsqrt.f32 %v1375_v7  ;;  %vm251_vm4 = vweird.f32 %v1321_v8  ;;  %v419_v11 = vmul.f32 %v1308_v40, %v418_v37  ;;  %566 = vmatpush.xpose.msra.mxu0 %v529_v10 }
  0xca   :  { %v397_v20 = vmul.f32 0.5, %v396_v53  ;;  %v226_v21 = vmul.f32 %v1369_v0, %v225_v36  ;;  %vm421_vm5 = vweird.f32 %v1308_v40  ;;  %vm230_vm6 = vweird.f32 %v1326_v2  ;;  %vm252_vm7 = vmor %vm250_vm10, %vm251_vm4 }
  0xcb   :  { %v237_v14 = vmul.f32 0.5, %v236_v58  ;;  %v409_v27 = vmul.f32 %v1314_v13, %v408_v12  ;;  %vm411_vm8 = vweird.f32 %v1314_v13  ;;  %v253_v39 = vsel %vm252_vm7, %v1321_v8, %v249_v4  ;;  %vm422_vm9 = vmor %vm420_vm13, %vm421_vm5 }
  0xcc   :  { %v227_v31 = vmul.f32 0.5, %v226_v21  ;;  %v141_v34 = vpop.xlane.xlu1 %140  ;;  %v109_v38 = vpop.xlane.xlu0 %108  ;;  %v398_v28 = vsub.f32 1.5, %v397_v20  ;;  %v528_v47 = vmul.f32 %v253_v39, %v942_v43  ;;  %v423_v52 = vsel %vm422_vm9, %v1308_v40, %v419_v11  ;;  %vm412_vm11 = vmor %vm410_vm0, %vm411_vm8 }
  0xcd   :  { %v1401_v29 = vpop.eup %746  ;;  %v238_v30 = vsub.f32 1.5, %v237_v14  ;;  %v1406_v22 = vmax.f32 %v141_v34, 1e-24  ;;  %v1408_v23 = vmax.f32 %v109_v38, 1e-24  ;;  %v545_v19 = vmul.f32 %v423_v52, %v940_v42 }
  0xce   :  { %v1410_v62 = vpop.eup %748  ;;  %v385_v24 = vmul.f32 %v1401_v29, %v1359_v51  ;;  %v228_v8 = vsub.f32 1.5, %v227_v31  ;;  %vm390_vm10 = vweird.f32 %v1359_v51  ;;  %567 = vmatpush.xpose.msra.mxu0 %v528_v47  ;;  %v413_v42 = vsel %vm412_vm11, %v1314_v13, %v409_v27 }
  0xcf   :  { %v1416_v15 = vpop.eup %750  ;;  %v375_v6 = vmul.f32 %v1410_v62, %v1367_v26  ;;  %752 = vrsqrt.f32 %v1406_v22  ;;  %586 = vmatpush.xpose.msra.mxu1 %v545_v19  ;;  %v239_v40 = vmul.f32 %v1362_v17, %v238_v30  ;;  %vm241_vm12 = vweird.f32 %v1362_v17  ;;  %v43_v30 = vld [vmem:[%s1521_s0] sm:$0xff] }
  0xd0   :  { %v386_v5 = vmul.f32 %v1401_v29, %v385_v24  ;;  %v215_v32 = vmul.f32 %v1416_v15, %v1375_v7  ;;  %754 = vrsqrt.f32 %v1408_v23  ;;  %v544_v18 = vmul.f32 %v413_v42, %v944_v44  ;;  %vm242_vm13 = vmor %vm240_vm2, %vm241_vm12 }
  0xd1   :  { %v376_v43 = vmul.f32 %v1410_v62, %v375_v6  ;;  %v399_v59 = vmul.f32 %v1355_v16, %v398_v28  ;;  %v243_v41 = vsel %vm242_vm13, %v1362_v17, %v239_v40  ;;  %vm401_vm14 = vweird.f32 %v1355_v16 }
  0xd2   :  { %v387_v3 = vmul.f32 0.5, %v386_v5  ;;  %v216_v45 = vmul.f32 %v1416_v15, %v215_v32  ;;  %v229_v13 = vmul.f32 %v1369_v0, %v228_v8  ;;  %v527_v1 = vmul.f32 %v243_v41, %v954_v49  ;;  %vm402_vm15 = vmor %vm400_vm3, %vm401_vm14 }
  0xd3   :  { %v377_v35 = vmul.f32 0.5, %v376_v43  ;;  %vm231_vm0 = vweird.f32 %v1369_v0  ;;  %587 = vmatpush.xpose.msra.mxu1 %v544_v18  ;;  %v403_v37 = vsel %vm402_vm15, %v1355_v16, %v399_v59  ;;  %vm221_vm2 = vweird.f32 %v1416_v15 }
  0xd4   :  { %v388_v25 = vsub.f32 1.5, %v387_v3  ;;  %v217_v33 = vmul.f32 0.5, %v216_v45  ;;  %vm232_vm1 = vmor %vm230_vm6, %vm231_vm0  ;;  %vm391_vm4 = vweird.f32 %v1401_v29  ;;  %568 = vmatpush.xpose.msra.mxu0 %v527_v1  ;;  %v543_v63 = vmul.f32 %v403_v37, %v952_v48  ;;  %v607_v48 = vld [vmem:[%s1523_s2] sm:$0xff] }
  0xd5   :  { %v753_v44 = vpop.eup %752  ;;  %v378_v57 = vsub.f32 1.5, %v377_v35  ;;  %v233_v12 = vsel %vm232_vm1, %v1369_v0, %v229_v13  ;;  %vm220_vm3 = vweird.f32 %v1375_v7  ;;  %vm392_vm5 = vmor %vm390_vm10, %vm391_vm4  ;;  %vm381_vm6 = vweird.f32 %v1410_v62 }
  0xd6   :  { %v755_v17 = vpop.eup %754  ;;  %v218_v9 = vsub.f32 1.5, %v217_v33  ;;  %v365_v49 = vmul.f32 %v753_v44, %v1406_v22  ;;  %v526_v2 = vmul.f32 %v233_v12, %v956_v50  ;;  %v389_v53 = vmul.f32 %v1401_v29, %v388_v25  ;;  %vm222_vm7 = vmor %vm220_vm3, %vm221_vm2 }
  0xd7   :  { %v205_v16 = vmul.f32 %v755_v17, %v1408_v23  ;;  %v379_v46 = vmul.f32 %v1410_v62, %v378_v57  ;;  %588 = vmatpush.xpose.msra.mxu1 %v543_v63  ;;  %vm380_vm8 = vweird.f32 %v1367_v26  ;;  %v815_v21 = vmov 0  }
  0xd8   :  { %v366_v36 = vmul.f32 %v753_v44, %v365_v49  ;;  %v219_v58 = vmul.f32 %v1416_v15, %v218_v9  ;;  %v393_v50 = vsel %vm392_vm5, %v1401_v29, %v389_v53  ;;  %569 = vmatpush.xpose.msra.mxu0 %v526_v2  ;;  %690 = vset.pattern.permute.xlu2 %v815_v21  ;;  %vm382_vm9 = vmor %vm380_vm8, %vm381_vm6  ;;  %vm371_vm10 = vweird.f32 %v753_v44 }
  0xd9   :  { %v206_v0 = vmul.f32 %v755_v17, %v205_v16  ;;  %v542_v20 = vmul.f32 %v393_v50, %v964_v54  ;;  %609 = vperm.xlu2 %690, %v607_v48   ;;  %691 = vset.pattern.permute.xlu0 %v815_v21  ;;  %v383_v11 = vsel %vm382_vm9, %v1410_v62, %v379_v46  ;;  %vm211_vm11 = vweird.f32 %v755_v17 }
  0xda   :  { %v367_v7 = vmul.f32 0.5, %v366_v36  ;;  %v223_v51 = vsel %vm222_vm7, %v1416_v15, %v219_v58  ;;  %vm370_vm12 = vweird.f32 %v1406_v22  ;;  %vm210_vm13 = vweird.f32 %v1408_v23 }
  0xdb   :  { %v207_v10 = vmul.f32 0.5, %v206_v0  ;;  %v525_v4 = vmul.f32 %v223_v51, %v966_v55  ;;  %589 = vmatpush.xpose.msra.mxu1 %v542_v20  ;;  %v541_v55 = vmul.f32 %v383_v11, %v968_v56  ;;  %vm372_vm14 = vmor %vm370_vm12, %vm371_vm10  ;;  %v600_v39 = vlaneseq }
  0xdc   :  { %v368_v14 = vsub.f32 1.5, %v367_v7  ;;  %vm212_vm15 = vmor %vm210_vm13, %vm211_vm11  ;;  %vm39_vm2 = vcmask 7168   ;;  %v817_v57 = vmov 0.0  }
  0xdd   :  { %v208_v26 = vsub.f32 1.5, %v207_v10  ;;  %570 = vmatpush.xpose.msra.mxu0 %v525_v4  ;;  %v601_v56 = vand.u32 127, %v600_v39  ;;  %40 = vst.msk [vmem:[%s1525_s4] sm:$0xff] %vm39_vm2, %v817_v57 }
  0xde   :  { %v369_v54 = vmul.f32 %v753_v44, %v368_v14  ;;  %42 = vst.msk [vmem:[%s1527_s6] sm:$0xff] %vm39_vm2, %v817_v57 }
  0xdf   :  { %v209_v31 = vmul.f32 %v755_v17, %v208_v26  ;;  %590 = vmatpush.xpose.msra.mxu1 %v541_v55  ;;  %v602_v22 = vadd.s32 128, %v601_v56  ;;  %41 = vst.msk [vmem:[%s1526_s5] sm:$0xff] %vm39_vm2, %v817_v57 }
  0xe0   :  { %v373_v34 = vsel %vm372_vm14, %v753_v44, %v369_v54 }
  0xe1   :  { %v213_v38 = vsel %vm212_vm15, %v755_v17, %v209_v31  ;;  %v540_v27 = vmul.f32 %v373_v34, %v976_v60 }
  0xe2   :  { %v524_v29 = vmul.f32 %v213_v38, %v978_v61 }
  0xe3   :  { %591 = vmatpush.xpose.msra.mxu1 %v540_v27 }
  0xe4   :  { %571 = vmatpush.xpose.msra.mxu0 %v524_v29  ;;  %v637_v37 = vld [vmem:[%s1525_s4] sm:$0xff] }
  0xe5   :  { %v649_v49 = vld [vmem:[%s1527_s6] sm:$0xff] }
  0xe6   :  { %592 = vmatmul.f32.vlgmr.msra.gmra.mxu1 %v43_v30  ;;  %v641_v2 = vld [vmem:[%s1526_s5] sm:$0xff] }
  0xe7   :  { %572 = vmatmul.f32.vlgmr.msra.gmra.mxu0 %v43_v30 }
 0x133   :  { %v610_v23 = vpop.permute.xlu2 %609 }
 0x134   :  { %vm611_vm0 = vcmp.eq.s32.totalorder %v601_v56, %v610_v23  ;;  %vm612_vm1 = vcmp.eq.s32.totalorder %v602_v22, %v610_v23 }
 0x163   :  { %v593_v24 = vpop.f32.mrf.mxu1 }
 0x164   :  { %v573_v62 = vpop.f32.mrf.mxu0  ;;  %v597_v47 = vmul.f32 64.0, %v593_v24  ;;  %v614_v52 = vsel %vm612_vm1, %v593_v24, 0.0 }
 0x165   :  { %v596_v28 = vmul.f32 64.0, %v573_v62  ;;  %v613_v60 = vsel %vm611_vm0, %v573_v62, 0.0  ;;  %v634_v61 = vadd.f32 %v593_v24, %v573_v62  ;;  %v616_v8 = vsub.f32 %v593_v24, %v614_v52 }
 0x166   :  { %v615_v15 = vsub.f32 %v573_v62, %v613_v60  ;;  %v631_v6 = vadd.f32 %v614_v52, %v613_v60  ;;  %599 = vst [vmem:[#allocation5 + $0x8] sm:$0xff] %v597_v47 }
 0x167   :  { %598 = vst [vmem:[#allocation5] sm:$0xff] %v596_v28  ;;  %635 = vadd.xlane.f32.xlu1 %v634_v61  ;;  %v683_v5 = vadd.f32 -0.34364575, %v616_v8 }
 0x168   :  { %v682_v19 = vadd.f32 -0.34364575, %v615_v15  ;;  %632 = vadd.xlane.f32.xlu0 %v631_v6  ;;  %663 = dma.vmem_to_hbm [thread:$0]  %s659_s9, 256, %s661_s7, [#allocation4]  }
 0x169   :  { %v620_v43 = vmul.f32 8.298629, %v683_v5 }
 0x16a   :  { %v619_v32 = vmul.f32 8.298629, %v682_v19 }
 0x16b   :  { %v622_v40 = vadd.f32 42.594, %v620_v43 }
 0x16c   :  { %v621_v42 = vadd.f32 42.594, %v619_v32 }
 0x16d   :  { %v624_v45 = vmul.f32 %v683_v5, %v622_v40 }
 0x16e   :  { %v623_v3 = vmul.f32 %v682_v19, %v621_v42 }
 0x170   :  { %756 = vtanh.f32 %v623_v3 }
 0x171   :  { %758 = vtanh.f32 %v624_v45 }
 0x176   :  { %v757_v18 = vpop.eup %756 }
 0x177   :  { %v759_v59 = vpop.eup %758  ;;  %v627_v35 = vadd.f32 1.0, %v757_v18 }
 0x178   :  { %v628_v41 = vadd.f32 1.0, %v759_v59 }
 0x179   :  { %v629_v13 = vmul.f32 0.5, %v627_v35 }
 0x17a   :  { %v630_v25 = vmul.f32 0.5, %v628_v41 }
 0x17b   :  { %v642_v33 = vmul.f32 %v629_v13, %v615_v15 }
 0x17c   :  { %v643_v1 = vmul.f32 %v630_v25, %v616_v8 }
 0x17e   :  { %v644_v44 = vadd.f32 %v643_v1, %v642_v33 }
 0x180   :  { %645 = vadd.xlane.f32.xlu0 %v644_v44 }
 0x1da   :  { %v636_v17 = vpop.xlane.xlu1 %635 }
 0x1db   :  { %v633_v9 = vpop.xlane.xlu0 %632 }
 0x1dc   :  { %v638_v63 = vadd.f32 %v637_v37, %v633_v9  ;;  %v650_v12 = vsub.f32 %v636_v17, %v633_v9 }
 0x1de   :  { %640 = vst.msk [vmem:[%s1525_s4] sm:$0xff] %vm39_vm2, %v638_v63  ;;  %v651_v16 = vadd.f32 %v650_v12, %v649_v49 }
 0x1e0   :  { %652 = vst.msk [vmem:[%s1527_s6] sm:$0xff] %vm39_vm2, %v651_v16 }
 0x1f3   :  { %v646_v53 = vpop.xlane.xlu0 %645 }
 0x1f4   :  { %v647_v36 = vadd.f32 %v646_v53, %v641_v2 }
 0x1f6   :  { %648 = vst.msk [vmem:[%s1526_s5] sm:$0xff] %vm39_vm2, %v647_v36 }
 0x1f7   :  { %810 = dma.done.wait [#allocation4], 256  }
 0x1f8   :  { %811 = vsyncadd [#allocation4], 4294967040 }
 0x1f9   :  { %680 = vsyncpa [#allocation3], 1 }
 0x1fa   :  { %681 = vsyncpa [#allocation4], 1 }

</bundles_post_ra>
